<compile_context>
chip_gen: v7x
topology: tpu7x:2x2x1
jax: 0.10.0
libtpu: 0.0.40
codegen_flags: <defaults>
</compile_context>

<pallas_src>
import jax
import jax.numpy as jnp
from jax.experimental import pallas as pl
from jax.experimental.pallas import tpu as pltpu

HIDDEN = 256
HEAD_PAD = 128      # lane-dense width for the 1-wide q head
BATCH_TILE = 512    # batch rows per grid step; safe for v5e/v6e/v7x VMEM


def _qnet_kernel(s_ref, a_ref, w1s_ref, w1a_ref, b1_ref,
                 w2_ref, b2_ref, w3_ref, b3_ref, q_ref):
    # fc1 on cat([state, action]) without materializing the concat:
    #   cat(s, a) @ W1 == s @ W1[:S] + a @ W1[S:]
    h1 = jnp.dot(s_ref[...], w1s_ref[...], preferred_element_type=jnp.float32)
    h1 = h1 + jnp.dot(a_ref[...], w1a_ref[...],
                      preferred_element_type=jnp.float32)
    h1 = jnp.maximum(h1 + b1_ref[...], 0.0)

    # fc2 + relu
    h2 = jnp.dot(h1, w2_ref[...], preferred_element_type=jnp.float32) + b2_ref[...]
    h2 = jnp.maximum(h2, 0.0)

    # fc3 head (lane-padded to HEAD_PAD; real q is column 0)
    q = jnp.dot(h2, w3_ref[...], preferred_element_type=jnp.float32) + b3_ref[...]
    q_ref[...] = q.astype(q_ref.dtype)


@jax.jit
def qnet_forward(state, action, params):
    """state: [B, S], action: [B, A]  ->  q: [B, 1] (float32)."""
    B, S = state.shape
    A = action.shape[1]

    # Split fc1 weight so the kernel never needs a concat.
    w1s = params["w1"][:S]
    w1a = params["w1"][S:]
    b1 = params["b1"]
    w2, b2 = params["w2"], params["b2"]
    # Lane-pad the 1-wide head to HEAD_PAD columns (extra columns are exact 0).
    w3 = jnp.pad(params["w3"], ((0, 0), (0, HEAD_PAD - params["w3"].shape[1])))
    b3 = jnp.pad(params["b3"], ((0, 0), (0, HEAD_PAD - params["b3"].shape[1])))

    # Batch tiling: single block for tiny B, otherwise BATCH_TILE-row tiles
    # (batch padded with zero rows to a multiple of the tile; sliced off after).
    if B <= BATCH_TILE:
        tm, pad = B, 0
    else:
        tm = BATCH_TILE
        pad = (-B) % BATCH_TILE
    if pad:
        state = jnp.pad(state, ((0, pad), (0, 0)))
        action = jnp.pad(action, ((0, pad), (0, 0)))
    Bp = B + pad
    grid = (Bp // tm,)

    row = lambda i: (i, 0)        # tiles that move with the batch grid step
    resident = lambda i: (0, 0)   # weights/biases stay resident in VMEM

    flops = 2 * Bp * (S * HIDDEN + A * HIDDEN + HIDDEN * HIDDEN + HIDDEN * HEAD_PAD)
    bytes_accessed = 4 * (
        Bp * (S + A + HEAD_PAD)
        + (S + A) * HIDDEN + HIDDEN
        + HIDDEN * HIDDEN + HIDDEN
        + HIDDEN * HEAD_PAD + HEAD_PAD
    )

    q_pad = pl.pallas_call(
        _qnet_kernel,
        out_shape=jax.ShapeDtypeStruct((Bp, HEAD_PAD), jnp.float32),
        grid=grid,
        in_specs=[
            pl.BlockSpec((tm, S), row),
            pl.BlockSpec((tm, A), row),
            pl.BlockSpec((S, HIDDEN), resident),
            pl.BlockSpec((A, HIDDEN), resident),
            pl.BlockSpec((1, HIDDEN), resident),
            pl.BlockSpec((HIDDEN, HIDDEN), resident),
            pl.BlockSpec((1, HIDDEN), resident),
            pl.BlockSpec((HIDDEN, HEAD_PAD), resident),
            pl.BlockSpec((1, HEAD_PAD), resident),
        ],
        out_specs=pl.BlockSpec((tm, HEAD_PAD), row),
        compiler_params=pltpu.CompilerParams(
            dimension_semantics=("parallel",)),
        cost_estimate=pl.CostEstimate(
            flops=flops, transcendentals=0, bytes_accessed=bytes_accessed),
    )(state, action, w1s, w1a, b1, w2, b2, w3, b3)

    return q_pad[:B, :1]


def init_qnet_params(key, state_dim, action_dim, hidden=HIDDEN):
    """Deterministic synthetic init (uniform, like PyTorch's default scale)."""
    ks = jax.random.split(key, 6)

    def lin(kw, kb, fan_in, fan_out):
        bound = 1.0 / jnp.sqrt(fan_in)
        w = jax.random.uniform(kw, (fan_in, fan_out), jnp.float32, -bound, bound)
        b = jax.random.uniform(kb, (1, fan_out), jnp.float32, -bound, bound)
        return w, b

    w1, b1 = lin(ks[0], ks[1], state_dim + action_dim, hidden)
    w2, b2 = lin(ks[2], ks[3], hidden, hidden)
    w3, b3 = lin(ks[4], ks[5], hidden, 1)
    return {"w1": w1, "b1": b1, "w2": w2, "b2": b2, "w3": w3, "b3": b3}


def _reference_forward(state, action, params):
    sa = jnp.concatenate([state, action], axis=1)
    h1 = jnp.maximum(sa @ params["w1"] + params["b1"], 0.0)
    h2 = jnp.maximum(h1 @ params["w2"] + params["b2"], 0.0)
    return h2 @ params["w3"] + params["b3"]


if __name__ == "__main__":
    key = jax.random.PRNGKey(0)
    k_param, k_s, k_a = jax.random.split(key, 3)

    batch = 2
    state_dim = 16
    action_dim = 8

    params = init_qnet_params(k_param, state_dim, action_dim)
    state = jax.random.normal(k_s, (batch, state_dim), jnp.float32)
    action = jax.random.normal(k_a, (batch, action_dim), jnp.float32)

    q = qnet_forward(state, action, params)
    jax.block_until_ready(q)

    # sanity check against a plain-JAX reference
    q_ref = _reference_forward(state, action, params)
    assert q.shape == (batch, 1)
    assert jnp.allclose(q, q_ref, atol=1e-4, rtol=1e-4)

    print("KERNEL_OK")
</pallas_src>

<mosaic_0001>
module attributes {stable_mosaic.version = 11 : i64} {
  func.func @_qnet_kernel(%arg0: i32, %arg1: memref<2x16xf32, #tpu.memory_space<vmem>>, %arg2: memref<2x8xf32, #tpu.memory_space<vmem>>, %arg3: memref<16x256xf32, #tpu.memory_space<vmem>>, %arg4: memref<8x256xf32, #tpu.memory_space<vmem>>, %arg5: memref<1x256xf32, #tpu.memory_space<vmem>>, %arg6: memref<256x256xf32, #tpu.memory_space<vmem>>, %arg7: memref<1x256xf32, #tpu.memory_space<vmem>>, %arg8: memref<256x128xf32, #tpu.memory_space<vmem>>, %arg9: memref<1x128xf32, #tpu.memory_space<vmem>>, %arg10: memref<2x128xf32, #tpu.memory_space<vmem>>) attributes {dimension_semantics = [#tpu.dimension_semantics<parallel>], iteration_bounds = array<i64: 1>, scalar_prefetch = 0 : i64, scratch_operands = 0 : i64, tpu.core_type = #tpu.core_type<tc>, window_params = [{transform_indices = @transform_0, window_bounds = array<i64: 2, 16>}, {transform_indices = @transform_1, window_bounds = array<i64: 2, 8>}, {pipeline_mode = #tpu.pipeline_mode<synchronous>, transform_indices = @transform_2, window_bounds = array<i64: 16, 256>}, {pipeline_mode = #tpu.pipeline_mode<synchronous>, transform_indices = @transform_3, window_bounds = array<i64: 8, 256>}, {pipeline_mode = #tpu.pipeline_mode<synchronous>, transform_indices = @transform_4, window_bounds = array<i64: 1, 256>}, {pipeline_mode = #tpu.pipeline_mode<synchronous>, transform_indices = @transform_5, window_bounds = array<i64: 256, 256>}, {pipeline_mode = #tpu.pipeline_mode<synchronous>, transform_indices = @transform_6, window_bounds = array<i64: 1, 256>}, {pipeline_mode = #tpu.pipeline_mode<synchronous>, transform_indices = @transform_7, window_bounds = array<i64: 256, 128>}, {pipeline_mode = #tpu.pipeline_mode<synchronous>, transform_indices = @transform_8, window_bounds = array<i64: 1, 128>}, {transform_indices = @transform_9, window_bounds = array<i64: 2, 128>}]} {
    %c0 = arith.constant 0 : index
    %c0_0 = arith.constant 0 : index
    %0 = vector.load %arg1[%c0, %c0_0] : memref<2x16xf32, #tpu.memory_space<vmem>>, vector<2x16xf32>
    %c0_1 = arith.constant 0 : index
    %c0_2 = arith.constant 0 : index
    %1 = vector.load %arg3[%c0_1, %c0_2] : memref<16x256xf32, #tpu.memory_space<vmem>>, vector<16x256xf32>
    %cst = arith.constant dense<0.000000e+00> : vector<2x256xf32>
    %2 = tpu.matmul %0, %1, %cst {dimension_numbers = #tpu.dot_dimension_numbers<[1], [0], [0], [1], [0, 0, 1, 1], [], []>} : vector<2x16xf32>, vector<16x256xf32>, vector<2x256xf32> -> vector<2x256xf32>
    %c0_3 = arith.constant 0 : index
    %c0_4 = arith.constant 0 : index
    %3 = vector.load %arg2[%c0_3, %c0_4] : memref<2x8xf32, #tpu.memory_space<vmem>>, vector<2x8xf32>
    %c0_5 = arith.constant 0 : index
    %c0_6 = arith.constant 0 : index
    %4 = vector.load %arg4[%c0_5, %c0_6] : memref<8x256xf32, #tpu.memory_space<vmem>>, vector<8x256xf32>
    %cst_7 = arith.constant dense<0.000000e+00> : vector<2x256xf32>
    %5 = tpu.matmul %3, %4, %cst_7 {dimension_numbers = #tpu.dot_dimension_numbers<[1], [0], [0], [1], [0, 0, 1, 1], [], []>} : vector<2x8xf32>, vector<8x256xf32>, vector<2x256xf32> -> vector<2x256xf32>
    %6 = arith.addf %2, %5 : vector<2x256xf32>
    %c0_8 = arith.constant 0 : index
    %c0_9 = arith.constant 0 : index
    %7 = vector.load %arg5[%c0_8, %c0_9] : memref<1x256xf32, #tpu.memory_space<vmem>>, vector<1x256xf32>
    %8 = vector.broadcast %7 : vector<1x256xf32> to vector<2x256xf32>
    %9 = arith.addf %6, %8 : vector<2x256xf32>
    %cst_10 = arith.constant 0.000000e+00 : f32
    %10 = vector.broadcast %cst_10 : f32 to vector<2x256xf32>
    %11 = arith.maximumf %9, %10 : vector<2x256xf32>
    %c0_11 = arith.constant 0 : index
    %c0_12 = arith.constant 0 : index
    %12 = vector.load %arg6[%c0_11, %c0_12] : memref<256x256xf32, #tpu.memory_space<vmem>>, vector<256x256xf32>
    %cst_13 = arith.constant dense<0.000000e+00> : vector<2x256xf32>
    %13 = tpu.matmul %11, %12, %cst_13 {dimension_numbers = #tpu.dot_dimension_numbers<[1], [0], [0], [1], [0, 0, 1, 1], [], []>} : vector<2x256xf32>, vector<256x256xf32>, vector<2x256xf32> -> vector<2x256xf32>
    %c0_14 = arith.constant 0 : index
    %c0_15 = arith.constant 0 : index
    %14 = vector.load %arg7[%c0_14, %c0_15] : memref<1x256xf32, #tpu.memory_space<vmem>>, vector<1x256xf32>
    %15 = vector.broadcast %14 : vector<1x256xf32> to vector<2x256xf32>
    %16 = arith.addf %13, %15 : vector<2x256xf32>
    %cst_16 = arith.constant 0.000000e+00 : f32
    %17 = vector.broadcast %cst_16 : f32 to vector<2x256xf32>
    %18 = arith.maximumf %16, %17 : vector<2x256xf32>
    %c0_17 = arith.constant 0 : index
    %c0_18 = arith.constant 0 : index
    %19 = vector.load %arg8[%c0_17, %c0_18] : memref<256x128xf32, #tpu.memory_space<vmem>>, vector<256x128xf32>
    %cst_19 = arith.constant dense<0.000000e+00> : vector<2x128xf32>
    %20 = tpu.matmul %18, %19, %cst_19 {dimension_numbers = #tpu.dot_dimension_numbers<[1], [0], [0], [1], [0, 0, 1, 1], [], []>} : vector<2x256xf32>, vector<256x128xf32>, vector<2x128xf32> -> vector<2x128xf32>
    %c0_20 = arith.constant 0 : index
    %c0_21 = arith.constant 0 : index
    %21 = vector.load %arg9[%c0_20, %c0_21] : memref<1x128xf32, #tpu.memory_space<vmem>>, vector<1x128xf32>
    %22 = vector.broadcast %21 : vector<1x128xf32> to vector<2x128xf32>
    %23 = arith.addf %20, %22 : vector<2x128xf32>
    %c0_22 = arith.constant 0 : index
    %c0_23 = arith.constant 0 : index
    %24 = vector.load %arg10[%c0_22, %c0_23] : memref<2x128xf32, #tpu.memory_space<vmem>>, vector<2x128xf32>
    tpu.vector_store %arg10[%c0_22, %c0_23], %23 {strides = array<i32>} : memref<2x128xf32, #tpu.memory_space<vmem>>, vector<2x128xf32>,
    return
  }
  func.func @transform_0(%arg0: i32) -> (i32, i32) {
    %c0_i32 = arith.constant 0 : i32
    %c0_i32_0 = arith.constant 0 : i32
    return %arg0, %c0_i32 : i32, i32
  }
  func.func @transform_1(%arg0: i32) -> (i32, i32) {
    %c0_i32 = arith.constant 0 : i32
    %c0_i32_0 = arith.constant 0 : i32
    return %arg0, %c0_i32 : i32, i32
  }
  func.func @transform_2(%arg0: i32) -> (i32, i32) {
    %c0_i32 = arith.constant 0 : i32
    %c0_i32_0 = arith.constant 0 : i32
    %c0_i32_1 = arith.constant 0 : i32
    return %c0_i32, %c0_i32_0 : i32, i32
  }
  func.func @transform_3(%arg0: i32) -> (i32, i32) {
    %c0_i32 = arith.constant 0 : i32
    %c0_i32_0 = arith.constant 0 : i32
    %c0_i32_1 = arith.constant 0 : i32
    return %c0_i32, %c0_i32_0 : i32, i32
  }
  func.func @transform_4(%arg0: i32) -> (i32, i32) {
    %c0_i32 = arith.constant 0 : i32
    %c0_i32_0 = arith.constant 0 : i32
    %c0_i32_1 = arith.constant 0 : i32
    return %c0_i32, %c0_i32_0 : i32, i32
  }
  func.func @transform_5(%arg0: i32) -> (i32, i32) {
    %c0_i32 = arith.constant 0 : i32
    %c0_i32_0 = arith.constant 0 : i32
    %c0_i32_1 = arith.constant 0 : i32
    return %c0_i32, %c0_i32_0 : i32, i32
  }
  func.func @transform_6(%arg0: i32) -> (i32, i32) {
    %c0_i32 = arith.constant 0 : i32
    %c0_i32_0 = arith.constant 0 : i32
    %c0_i32_1 = arith.constant 0 : i32
    return %c0_i32, %c0_i32_0 : i32, i32
  }
  func.func @transform_7(%arg0: i32) -> (i32, i32) {
    %c0_i32 = arith.constant 0 : i32
    %c0_i32_0 = arith.constant 0 : i32
    %c0_i32_1 = arith.constant 0 : i32
    return %c0_i32, %c0_i32_0 : i32, i32
  }
  func.func @transform_8(%arg0: i32) -> (i32, i32) {
    %c0_i32 = arith.constant 0 : i32
    %c0_i32_0 = arith.constant 0 : i32
    %c0_i32_1 = arith.constant 0 : i32
    return %c0_i32, %c0_i32_0 : i32, i32
  }
  func.func @transform_9(%arg0: i32) -> (i32, i32) {
    %c0_i32 = arith.constant 0 : i32
    %c0_i32_0 = arith.constant 0 : i32
    return %arg0, %c0_i32 : i32, i32
  }
}

</mosaic_0001>

<bundles_post_ra>
// kernel: qnet_forward.1
= control target key start
LH: loop header
LB: loop body
LE: loop exit
PB: predicated region body
PF: predicated region fallthrough
CT: control target
= control target key end

     0   :  { %v610_v2 = vmov 0.0   ;;  %vm40_vm0 = vcmask 64512   ;;  %vm115_vm1 = vcmask 130048   ;;  %s985_s3 = inlined_call_operand.vmem [shape: f32[8,256], index: 3, kind: input, shape index: {}]   ;;  %s986_s1 = inlined_call_operand.vmem [shape: f32[2,8], index: 1, kind: input, shape index: {}]   ;;  %s987_s2 = inlined_call_operand.vmem [shape: f32[16,256], index: 2, kind: input, shape index: {}]   ;;  %s988_s5 = inlined_call_operand.vmem [shape: f32[256,256], index: 5, kind: input, shape index: {}]   ;;  %s989_s0 = inlined_call_operand.vmem [shape: f32[2,16], index: 0, kind: input, shape index: {}]   ;;  %s990_s7 = inlined_call_operand.vmem [shape: f32[256,128], index: 7, kind: input, shape index: {}]   ;;  %s991_s4 = inlined_call_operand.vmem [shape: f32[1,256], index: 4, kind: input, shape index: {}]   ;;  %s992_s6 = inlined_call_operand.vmem [shape: f32[1,256], index: 6, kind: input, shape index: {}]   ;;  %s993_s8 = inlined_call_operand.vmem [shape: f32[1,128], index: 8, kind: input, shape index: {}]   ;;  %s994_s9 = inlined_call_operand.vmem [shape: f32[2,128], index: 9, kind: output, shape index: {}]  }
   0x1   :  { %v39_v0 = vld [vmem:[%s985_s3 + $0x8] sm:$0xff]  ;;  %v38_v1 = vld [vmem:[%s985_s3] sm:$0xff]  ;;  %108 = vmatprep.mubr.f32.mxu0 %v610_v2  ;;  %v36_v5 = vld [vmem:[%s987_s2 + $0x18] sm:$0xff] }
   0x2   :  { %v37_v3 = vld [vmem:[%s986_s1] sm:$0x3]  ;;  %44 = vmatprep.subr.mxu0 %v39_v0  ;;  %v34_v4 = vld [vmem:[%s987_s2 + $0x8] sm:$0xff]  ;;  %v35_v8 = vld [vmem:[%s987_s2 + $0x10] sm:$0xff] }
   0x3   :  { %v33_v6 = vld [vmem:[%s987_s2] sm:$0xff]  ;;  %45 = vmatpush1.msra.mxu0 %v38_v1  ;;  %v507_v7 = vpack.c.bf16 %v36_v5, %v34_v4  ;;  %v207_v9 = vld [vmem:[%s988_s5 + $0x8] sm:$0xff]  ;;  %v209_v11 = vld [vmem:[%s988_s5 + $0x18] sm:$0xff] }
   0x4   :  { %469 = vmatmul.mubr.msk.f32.vlgmr.msra.gmra.mrb[0].mxu0 %vm40_vm0, %v37_v3  ;;  %v509_v10 = vpack.c.bf16 %v35_v8, %v33_v6  ;;  %v206_v12 = vld [vmem:[%s988_s5] sm:$0xff]  ;;  %v208_v13 = vld [vmem:[%s988_s5 + $0x10] sm:$0xff]  ;;  %v511_v14 = vpack.c.bf16 %v209_v11, %v207_v9  ;;  %v211_v16 = vld [vmem:[%s988_s5 + $0x28] sm:$0xff] }
   0x5   :  { %508 = vmatprep.subr.bf16.mxu0 %v507_v7  ;;  %183 = vmatprep.mubr.f32.mxu0 %v610_v2  ;;  %v513_v15 = vpack.c.bf16 %v208_v13, %v206_v12  ;;  %v213_v17 = vld [vmem:[%s988_s5 + $0x38] sm:$0xff]  ;;  %v210_v18 = vld [vmem:[%s988_s5 + $0x20] sm:$0xff]  ;;  %v212_v20 = vld [vmem:[%s988_s5 + $0x30] sm:$0xff] }
   0x6   :  { %510 = vmatpush1.bf16.msra.mxu0 %v509_v10  ;;  %v515_v19 = vpack.c.bf16 %v213_v17, %v211_v16  ;;  %v215_v21 = vld [vmem:[%s988_s5 + $0x48] sm:$0xff]  ;;  %v217_v22 = vld [vmem:[%s988_s5 + $0x58] sm:$0xff]  ;;  %512 = vmatprep.subr.bf16.mxu1 %v511_v14  ;;  %v517_v23 = vpack.c.bf16 %v212_v20, %v210_v18  ;;  %v32_v24 = vld [vmem:[%s989_s0] sm:$0x3] }
   0x7   :  { %514 = vmatpush1.bf16.msra.mxu1 %v513_v15  ;;  %v519_v25 = vpack.c.bf16 %v217_v22, %v215_v21  ;;  %v214_v26 = vld [vmem:[%s988_s5 + $0x40] sm:$0xff]  ;;  %v216_v27 = vld [vmem:[%s988_s5 + $0x50] sm:$0xff]  ;;  %v219_v28 = vld [vmem:[%s988_s5 + $0x68] sm:$0xff] }
   0x8   :  { %516 = vmatprep.subr.bf16.mxu1 %v515_v19  ;;  %v221_v29 = vld [vmem:[%s988_s5 + $0x78] sm:$0xff]  ;;  %v521_v30 = vpack.c.bf16 %v216_v27, %v214_v26  ;;  %v218_v32 = vld [vmem:[%s988_s5 + $0x60] sm:$0xff]  ;;  %v220_v33 = vld [vmem:[%s988_s5 + $0x70] sm:$0xff] }
   0x9   :  { %v523_v31 = vpack.c.bf16 %v221_v29, %v219_v28  ;;  %v223_v34 = vld [vmem:[%s988_s5 + $0x88] sm:$0xff]  ;;  %v225_v35 = vld [vmem:[%s988_s5 + $0x98] sm:$0xff]  ;;  %v525_v36 = vpack.c.bf16 %v220_v33, %v218_v32  ;;  %v222_v38 = vld [vmem:[%s988_s5 + $0x80] sm:$0xff] }
   0xa   :  { %v527_v37 = vpack.c.bf16 %v225_v35, %v223_v34  ;;  %v224_v39 = vld [vmem:[%s988_s5 + $0x90] sm:$0xff]  ;;  %v227_v40 = vld [vmem:[%s988_s5 + $0xa8] sm:$0xff]  ;;  %v229_v41 = vld [vmem:[%s988_s5 + $0xb8] sm:$0xff] }
   0xb   :  { %518 = vmatpush1.bf16.msra.mxu1 %v517_v23  ;;  %v529_v42 = vpack.c.bf16 %v224_v39, %v222_v38  ;;  %v531_v43 = vpack.c.bf16 %v229_v41, %v227_v40  ;;  %v226_v44 = vld [vmem:[%s988_s5 + $0xa0] sm:$0xff]  ;;  %v228_v45 = vld [vmem:[%s988_s5 + $0xb0] sm:$0xff]  ;;  %v231_v46 = vld [vmem:[%s988_s5 + $0xc8] sm:$0xff] }
   0xc   :  { %470 = vmatmul.mubr.msk.f32.vlgmr.msra.gmra.mrb[0].mxu0 %vm115_vm1, %v32_v24  ;;  %520 = vmatprep.subr.bf16.mxu1 %v519_v25  ;;  %v233_v47 = vld [vmem:[%s988_s5 + $0xd8] sm:$0xff]  ;;  %v533_v48 = vpack.c.bf16 %v228_v45, %v226_v44  ;;  %v230_v50 = vld [vmem:[%s988_s5 + $0xc0] sm:$0xff]  ;;  %v232_v51 = vld [vmem:[%s988_s5 + $0xd0] sm:$0xff] }
   0xd   :  { %v535_v49 = vpack.c.bf16 %v233_v47, %v231_v46  ;;  %v235_v52 = vld [vmem:[%s988_s5 + $0xe8] sm:$0xff]  ;;  %v237_v53 = vld [vmem:[%s988_s5 + $0xf8] sm:$0xff]  ;;  %v537_v54 = vpack.c.bf16 %v232_v51, %v230_v50  ;;  %v234_v56 = vld [vmem:[%s988_s5 + $0xe0] sm:$0xff] }
   0xe   :  { %v539_v55 = vpack.c.bf16 %v237_v53, %v235_v52  ;;  %v236_v57 = vld [vmem:[%s988_s5 + $0xf0] sm:$0xff]  ;;  %v239_v58 = vld [vmem:[%s988_s5 + $0x108] sm:$0xff]  ;;  %v241_v59 = vld [vmem:[%s988_s5 + $0x118] sm:$0xff] }
   0xf   :  { %522 = vmatpush1.bf16.msra.mxu1 %v521_v30  ;;  %v541_v60 = vpack.c.bf16 %v236_v57, %v234_v56  ;;  %v543_v61 = vpack.c.bf16 %v241_v59, %v239_v58  ;;  %v238_v62 = vld [vmem:[%s988_s5 + $0x100] sm:$0xff]  ;;  %v240_v63 = vld [vmem:[%s988_s5 + $0x110] sm:$0xff]  ;;  %v243_v0 = vld [vmem:[%s988_s5 + $0x128] sm:$0xff] }
  0x10   :  { %524 = vmatprep.subr.bf16.mxu1 %v523_v31  ;;  %v245_v1 = vld [vmem:[%s988_s5 + $0x138] sm:$0xff]  ;;  %v545_v2 = vpack.c.bf16 %v240_v63, %v238_v62  ;;  %v242_v4 = vld [vmem:[%s988_s5 + $0x120] sm:$0xff]  ;;  %v244_v5 = vld [vmem:[%s988_s5 + $0x130] sm:$0xff] }
  0x11   :  { %v547_v3 = vpack.c.bf16 %v245_v1, %v243_v0  ;;  %v247_v6 = vld [vmem:[%s988_s5 + $0x148] sm:$0xff]  ;;  %v249_v7 = vld [vmem:[%s988_s5 + $0x158] sm:$0xff]  ;;  %v549_v8 = vpack.c.bf16 %v244_v5, %v242_v4  ;;  %v246_v10 = vld [vmem:[%s988_s5 + $0x140] sm:$0xff] }
  0x12   :  { %v551_v9 = vpack.c.bf16 %v249_v7, %v247_v6  ;;  %v248_v11 = vld [vmem:[%s988_s5 + $0x150] sm:$0xff]  ;;  %v251_v12 = vld [vmem:[%s988_s5 + $0x168] sm:$0xff]  ;;  %v253_v13 = vld [vmem:[%s988_s5 + $0x178] sm:$0xff] }
  0x13   :  { %526 = vmatpush1.bf16.msra.mxu1 %v525_v36  ;;  %v553_v14 = vpack.c.bf16 %v248_v11, %v246_v10  ;;  %v555_v15 = vpack.c.bf16 %v253_v13, %v251_v12  ;;  %v250_v16 = vld [vmem:[%s988_s5 + $0x160] sm:$0xff]  ;;  %v252_v17 = vld [vmem:[%s988_s5 + $0x170] sm:$0xff]  ;;  %v255_v18 = vld [vmem:[%s988_s5 + $0x188] sm:$0xff] }
  0x14   :  { %528 = vmatprep.subr.bf16.mxu1 %v527_v37  ;;  %v257_v19 = vld [vmem:[%s988_s5 + $0x198] sm:$0xff]  ;;  %v557_v20 = vpack.c.bf16 %v252_v17, %v250_v16  ;;  %v254_v22 = vld [vmem:[%s988_s5 + $0x180] sm:$0xff]  ;;  %v256_v23 = vld [vmem:[%s988_s5 + $0x190] sm:$0xff] }
  0x15   :  { %v559_v21 = vpack.c.bf16 %v257_v19, %v255_v18  ;;  %v259_v24 = vld [vmem:[%s988_s5 + $0x1a8] sm:$0xff]  ;;  %v261_v25 = vld [vmem:[%s988_s5 + $0x1b8] sm:$0xff]  ;;  %v561_v26 = vpack.c.bf16 %v256_v23, %v254_v22  ;;  %v258_v28 = vld [vmem:[%s988_s5 + $0x1a0] sm:$0xff]  ;;  %v192_v18 = vlaneseq }
  0x16   :  { %v563_v27 = vpack.c.bf16 %v261_v25, %v259_v24  ;;  %v260_v29 = vld [vmem:[%s988_s5 + $0x1b0] sm:$0xff]  ;;  %v263_v30 = vld [vmem:[%s988_s5 + $0x1c8] sm:$0xff]  ;;  %v265_v31 = vld [vmem:[%s988_s5 + $0x1d8] sm:$0xff] }
  0x17   :  { %530 = vmatpush1.bf16.msra.mxu1 %v529_v42  ;;  %v565_v32 = vpack.c.bf16 %v260_v29, %v258_v28  ;;  %v567_v33 = vpack.c.bf16 %v265_v31, %v263_v30  ;;  %v262_v34 = vld [vmem:[%s988_s5 + $0x1c0] sm:$0xff]  ;;  %v264_v35 = vld [vmem:[%s988_s5 + $0x1d0] sm:$0xff]  ;;  %v267_v37 = vld [vmem:[%s988_s5 + $0x1e8] sm:$0xff]  ;;  %v193_v19 = vshrl.u32 %v192_v18, 7 }
  0x18   :  { %532 = vmatprep.subr.bf16.mxu1 %v531_v43  ;;  %v569_v36 = vpack.c.bf16 %v264_v35, %v262_v34  ;;  %v269_v38 = vld [vmem:[%s988_s5 + $0x1f8] sm:$0xff]  ;;  %v266_v40 = vld [vmem:[%s988_s5 + $0x1e0] sm:$0xff]  ;;  %v268_v41 = vld [vmem:[%s988_s5 + $0x1f0] sm:$0xff] }
  0x19   :  { %v571_v39 = vpack.c.bf16 %v269_v38, %v267_v37  ;;  %v573_v42 = vpack.c.bf16 %v268_v41, %v266_v40  ;;  %v371_v43 = vld [vmem:[%s990_s7 + $0x80] sm:$0xff]  ;;  %v372_v44 = vld [vmem:[%s990_s7 + $0x88] sm:$0xff]  ;;  %v357_v52 = vld [vmem:[%s990_s7 + $0x10] sm:$0xff]  ;;  %v198_v22 = vsub.s32 1, %v193_v19 }
  0x1a   :  { %v355_v45 = vld [vmem:[%s990_s7] sm:$0xff]  ;;  %v575_v46 = vpack.c.bf16 %v372_v44, %v371_v43  ;;  %v356_v47 = vld [vmem:[%s990_s7 + $0x8] sm:$0xff]  ;;  %v358_v53 = vld [vmem:[%s990_s7 + $0x18] sm:$0xff] }
  0x1b   :  { %534 = vmatpush1.bf16.msra.mxu1 %v533_v48  ;;  %v373_v48 = vld [vmem:[%s990_s7 + $0x90] sm:$0xff]  ;;  %v577_v50 = vpack.c.bf16 %v356_v47, %v355_v45  ;;  %v581_v56 = vpack.c.bf16 %v358_v53, %v357_v52  ;;  %v359_v58 = vld [vmem:[%s990_s7 + $0x20] sm:$0xff]  ;;  %v360_v59 = vld [vmem:[%s990_s7 + $0x28] sm:$0xff] }
  0x1c   :  { %536 = vmatprep.subr.bf16.mxu1 %v535_v49  ;;  %v374_v49 = vld [vmem:[%s990_s7 + $0x98] sm:$0xff]  ;;  %576 = vmatprep.subr.bf16.mxu0 %v575_v46  ;;  %v585_v62 = vpack.c.bf16 %v360_v59, %v359_v58  ;;  %v361_v0 = vld [vmem:[%s990_s7 + $0x30] sm:$0xff]  ;;  %v363_v6 = vld [vmem:[%s990_s7 + $0x40] sm:$0xff] }
  0x1d   :  { %v579_v51 = vpack.c.bf16 %v374_v49, %v373_v48  ;;  %578 = vmatpush3.bf16.msra.mxu0 %v577_v50  ;;  %v362_v1 = vld [vmem:[%s990_s7 + $0x38] sm:$0xff]  ;;  %v364_v7 = vld [vmem:[%s990_s7 + $0x48] sm:$0xff]  ;;  %v365_v12 = vld [vmem:[%s990_s7 + $0x50] sm:$0xff] }
  0x1e   :  { %v589_v4 = vpack.c.bf16 %v362_v1, %v361_v0  ;;  %v593_v10 = vpack.c.bf16 %v364_v7, %v363_v6  ;;  %v366_v13 = vld [vmem:[%s990_s7 + $0x58] sm:$0xff]  ;;  %v367_v31 = vld [vmem:[%s990_s7 + $0x60] sm:$0xff]  ;;  %v385_v34 = vld [vmem:[%s990_s7 + $0xf0] sm:$0xff] }
  0x1f   :  { %538 = vmatpush1.bf16.msra.mxu1 %v537_v54  ;;  %v375_v54 = vld [vmem:[%s990_s7 + $0xa0] sm:$0xff]  ;;  %580 = vmatprep.subr.bf16.mxu0 %v579_v51  ;;  %v597_v16 = vpack.c.bf16 %v366_v13, %v365_v12  ;;  %v386_v35 = vld [vmem:[%s990_s7 + $0xf8] sm:$0xff]  ;;  %v369_v37 = vld [vmem:[%s990_s7 + $0x70] sm:$0xff] }
  0x20   :  { %540 = vmatprep.subr.bf16.mxu1 %v539_v55  ;;  %v376_v55 = vld [vmem:[%s990_s7 + $0xa8] sm:$0xff]  ;;  %v370_v38 = vld [vmem:[%s990_s7 + $0x78] sm:$0xff]  ;;  %v270_v40 = vld [vmem:[%s992_s6] sm:$0x3] }
  0x21   :  { %v583_v57 = vpack.c.bf16 %v376_v55, %v375_v54  ;;  %582 = vmatpush3.bf16.msra.mxu0 %v581_v56  ;;  %v471_v50 = vld [vmem:[%s993_s8] ss:$0 sm:$0xff] }
  0x23   :  { %542 = vmatpush1.bf16.msra.mxu1 %v541_v60  ;;  %v377_v60 = vld [vmem:[%s990_s7 + $0xb0] sm:$0xff]  ;;  %584 = vmatprep.subr.bf16.mxu0 %v583_v57 }
  0x24   :  { %544 = vmatprep.subr.bf16.mxu1 %v543_v61  ;;  %v378_v61 = vld [vmem:[%s990_s7 + $0xb8] sm:$0xff] }
  0x25   :  { %v587_v63 = vpack.c.bf16 %v378_v61, %v377_v60  ;;  %586 = vmatpush3.bf16.msra.mxu0 %v585_v62 }
  0x27   :  { %546 = vmatpush1.bf16.msra.mxu1 %v545_v2  ;;  %v379_v2 = vld [vmem:[%s990_s7 + $0xc0] sm:$0xff]  ;;  %588 = vmatprep.subr.bf16.mxu0 %v587_v63 }
  0x28   :  { %548 = vmatprep.subr.bf16.mxu1 %v547_v3  ;;  %v380_v3 = vld [vmem:[%s990_s7 + $0xc8] sm:$0xff] }
  0x29   :  { %v591_v5 = vpack.c.bf16 %v380_v3, %v379_v2  ;;  %590 = vmatpush3.bf16.msra.mxu0 %v589_v4 }
  0x2b   :  { %550 = vmatpush1.bf16.msra.mxu1 %v549_v8  ;;  %v381_v8 = vld [vmem:[%s990_s7 + $0xd0] sm:$0xff]  ;;  %592 = vmatprep.subr.bf16.mxu0 %v591_v5 }
  0x2c   :  { %552 = vmatprep.subr.bf16.mxu1 %v551_v9  ;;  %v382_v9 = vld [vmem:[%s990_s7 + $0xd8] sm:$0xff] }
  0x2d   :  { %v595_v11 = vpack.c.bf16 %v382_v9, %v381_v8  ;;  %594 = vmatpush3.bf16.msra.mxu0 %v593_v10 }
  0x2f   :  { %554 = vmatpush1.bf16.msra.mxu1 %v553_v14  ;;  %v383_v14 = vld [vmem:[%s990_s7 + $0xe0] sm:$0xff]  ;;  %596 = vmatprep.subr.bf16.mxu0 %v595_v11 }
  0x30   :  { %556 = vmatprep.subr.bf16.mxu1 %v555_v15  ;;  %v384_v15 = vld [vmem:[%s990_s7 + $0xe8] sm:$0xff] }
  0x31   :  { %v599_v17 = vpack.c.bf16 %v384_v15, %v383_v14  ;;  %598 = vmatpush3.bf16.msra.mxu0 %v597_v16 }
  0x33   :  { %558 = vmatpush1.bf16.msra.mxu1 %v557_v20  ;;  %600 = vmatprep.subr.bf16.mxu0 %v599_v17  ;;  %v194_v20 = vsub.s32 0, %v193_v19 }
  0x34   :  { %560 = vmatprep.subr.bf16.mxu1 %v559_v21  ;;  %v190_v21 = vld [vmem:[%s991_s4] sm:$0x3] }
  0x35   :  { %v195_v23 = vrot.slane %v190_v21, %v194_v20  ;;  %v199_v24 = vrot.slane %v190_v21, %v198_v22  ;;  %v275_v41 = vrot.slane %v270_v40, %v194_v20 }
  0x37   :  { %562 = vmatpush1.bf16.msra.mxu1 %v561_v26 }
  0x38   :  { %564 = vmatprep.subr.bf16.mxu1 %v563_v27 }
  0x3b   :  { %566 = vmatpush1.bf16.msra.mxu1 %v565_v32  ;;  %v368_v32 = vld [vmem:[%s990_s7 + $0x68] sm:$0xff] }
  0x3c   :  { %568 = vmatprep.subr.bf16.mxu1 %v567_v33  ;;  %v601_v33 = vpack.c.bf16 %v368_v32, %v367_v31 }
  0x3e   :  { %602 = vmatpush3.bf16.msra.mxu0 %v601_v33 }
  0x3f   :  { %570 = vmatpush1.bf16.msra.mxu1 %v569_v36  ;;  %v603_v36 = vpack.c.bf16 %v386_v35, %v385_v34 }
  0x40   :  { %572 = vmatprep.subr.bf16.mxu1 %v571_v39  ;;  %v605_v39 = vpack.c.bf16 %v370_v38, %v369_v37 }
  0x41   :  { %604 = vmatprep.subr.bf16.mxu0 %v603_v36 }
  0x42   :  { %606 = vmatpush3.bf16.msra.mxu0 %v605_v39 }
  0x43   :  { %574 = vmatpush1.bf16.msra.mxu1 %v573_v42  ;;  %v279_v42 = vrot.slane %v270_v40, %v198_v22 }
  0xdf   :  { %v185_v25 = vpop.f32.mrb[0].mxu0 }
  0xe0   :  { %v202_v26 = vadd.f32 %v195_v23, %v185_v25  ;;  %v187_v27 = vpop.f32.mrb[1].mxu0 }
  0xe1   :  { %v203_v28 = vadd.f32 %v199_v24, %v187_v27 }
  0xe2   :  { %v204_v30 = vmax.f32 %v202_v26, 0.0 }
  0xe3   :  { %v205_v29 = vmax.f32 %v203_v28, 0.0 }
  0xe5   :  { %346 = vmatprep.mubr.f32.mxu1 %v205_v29 }
  0xe6   :  { %347 = vmatmul.mubr.f32.vlgmr.msra.gmra.mrb[0].mxu1 %v204_v30 }
 0x1b9   :  { %v348_v43 = vpop.f32.mrb[0].mxu1 }
 0x1ba   :  { %v349_v44 = vadd.f32 %v348_v43, %v275_v41  ;;  %v350_v45 = vpop.f32.mrb[1].mxu1 }
 0x1bb   :  { %v351_v46 = vadd.f32 %v350_v45, %v279_v42 }
 0x1bc   :  { %v353_v48 = vmax.f32 %v349_v44, 0.0 }
 0x1bd   :  { %v354_v47 = vmax.f32 %v351_v46, 0.0 }
 0x1bf   :  { %458 = vmatprep.mubr.f32.mxu0 %v354_v47 }
 0x1c0   :  { %459 = vmatmul.mubr.f32.vlgmr.msra.gmra.mrb[2].mxu0 %v353_v48 }
 0x293   :  { %v504_v49 = vpop.f32.mrb[2].mxu0 }
 0x294   :  { %v505_v51 = vpop.f32.mrb[3].mxu0 }
 0x295   :  { %v506_v52 = vadd.f32 %v505_v51, %v504_v49 }
 0x297   :  { %v461_v53 = vadd.f32 %v506_v52, %v471_v50 }
 0x299   :  { %464 = vst [vmem:[%s994_s9] sm:$0x3] %v461_v53 }

</bundles_post_ra>
